<compile_context>
chip_gen: v7x
topology: tpu7x:2x2x1
jax: 0.10.0
libtpu: 0.0.40
codegen_flags: <defaults>
</compile_context>

<pallas_src>
import functools

import jax
import jax.numpy as jnp
from jax.experimental import pallas as pl
from jax.experimental.pallas import tpu as pltpu


def _up8(n):
    return ((n + 7) // 8) * 8


def _pack_layout(input_size, hidden_size):
    """Row offsets (8-aligned) of each section inside the packed weight array."""
    H = hidden_size
    r_win = 0                       # (I, 8H)  input projection (layer-2 cols zero)
    r_bin = _up8(input_size)        # (1, 8H)  combined biases, interleaved
    r_wrec = r_bin + 8              # (2H, 8H) fused recurrent weight
    r_wreg = r_wrec + _up8(2 * H)   # (H, O)   regression weight (lane-padded)
    r_breg = r_wreg + _up8(H)       # (1, O)   regression bias
    rows = r_breg + 8
    return r_win, r_bin, r_wrec, r_wreg, r_breg, rows


def _lstm_reg_kernel(x_ref,               # (S*B, I)      f32
                     w_ref,               # (rows, 8H)    f32 packed weights
                     out_ref,             # (S*B, O)      f32
                     h2_scr,              # (S*B, H)      f32 VMEM scratch
                     *, seq_len, batch, hidden_size, input_size, output_size):
    S, B, H, I, O = seq_len, batch, hidden_size, input_size, output_size
    r_win, r_bin, r_wrec, r_wreg, r_breg, _ = _pack_layout(I, H)

    # ---- unpack the single packed weight array (static slices, prologue only).
    w_in = w_ref[r_win:r_win + I, :]              # (I, 8H)
    b_in = w_ref[r_bin:r_bin + 1, :]              # (1, 8H)
    w_rec = w_ref[r_wrec:r_wrec + 2 * H, :]       # (2H, 8H)
    w_reg = w_ref[r_wreg:r_wreg + H, 0:O]         # (H, O)
    b_reg = w_ref[r_breg:r_breg + 1, 0:O]         # (1, O)

    # ---- hoisted K=180 input projection for ALL timesteps (off the serial
    #      path).  Row block t: "layer-1" column blocks hold x(t)@Wih1 + b1
    #      (g-gate pre-scaled by 2), "layer-2" blocks hold just b2.
    xg8 = jnp.dot(x_ref[...], w_in,
                  preferred_element_type=jnp.float32) + b_in      # (S*B, 8H)

    def gate_act(g):
        # One sigmoid over the packed 8H gates of BOTH layers.  g-gate columns
        # were pre-scaled by 2, so tanh(g) = 2*sigmoid(2g) - 1 (no tanh push).
        sg = jax.nn.sigmoid(g)
        i_pk = sg[:, 0:2 * H]                       # [i1 | i2]
        f_pk = sg[:, 2 * H:4 * H]                   # [f1 | f2]
        g_pk = 2.0 * sg[:, 4 * H:6 * H] - 1.0       # [tanh g1 | tanh g2]
        o_pk = sg[:, 6 * H:8 * H]                   # [o1 | o2]
        return i_pk, f_pk, g_pk, o_pk

    def tanh_v(v):                                   # tanh via one sigmoid push
        return 2.0 * jax.nn.sigmoid(2.0 * v) - 1.0

    # ---- step 0 (zero initial state): no recurrent matmul, no layer-2 work.
    i_pk, _, g_pk, o_pk = gate_act(xg8[0:B, :])
    lane = jax.lax.broadcasted_iota(jnp.int32, (B, 2 * H), 1)
    l1_mask = (lane < H).astype(jnp.float32)         # keep layer-1 half only
    cc = l1_mask * (i_pk * g_pk)                     # [c1(0) | 0]
    hh = o_pk * tanh_v(cc)                           # [h1(0) | 0]  (tanh(0)=0)

    # ---- pipelined recurrence.  Stage s does ONE (B,2H)@(2H,8H) matmul giving
    #      layer-1 recurrent gates for step s+1 AND layer-2 gates for step s,
    #      then one gate sigmoid + one tanh(c) push cover both layers.
    for s in range(S):
        mm = jnp.dot(hh, w_rec, preferred_element_type=jnp.float32)   # (B, 8H)
        # layer-1 half of `add` is x(s+1)@Wih1+b1; layer-2 half is b2.  For the
        # last stage the layer-1 half is never used, so just add the bias row.
        add = xg8[(s + 1) * B:(s + 2) * B, :] if s + 1 < S else b_in
        i_pk, f_pk, g_pk, o_pk = gate_act(mm + add)
        cc = f_pk * cc + i_pk * g_pk                 # [c1(s+1) | c2(s)]
        hh = o_pk * tanh_v(cc)                       # [h1(s+1) | h2(s)]
        # store h2(s) to VMEM scratch at a static offset (off the serial path).
        h2_scr[s * B:(s + 1) * B, :] = hh[:, H:2 * H]

    # ---- regression head hoisted: one matmul + one dense store.
    out = jnp.dot(h2_scr[...], w_reg,
                  preferred_element_type=jnp.float32) + b_reg
    out_ref[...] = out.astype(out_ref.dtype)


def pack_weights(params):
    """Pack all weights/biases into ONE pre-padded f32 array (done once,
    outside the per-call hot path).

    Gate-column layout (each block H wide): [i1, i2, f1, f2, 2*g1, 2*g2, o1, o2]
    where '1' = LSTM layer 1, '2' = LSTM layer 2; g-gate columns are pre-scaled
    by 2 so tanh(g) = 2*sigmoid(2g) - 1 comes from the shared sigmoid.
    """
    wih1, whh1, b1, wih2, whh2, b2, wreg, breg = params
    I = wih1.shape[0]
    H = whh1.shape[0]
    O = wreg.shape[1]
    r_win, r_bin, r_wrec, r_wreg, r_breg, rows = _pack_layout(I, H)

    def interleave(a1, a2):
        blocks = []
        for gi in range(4):                      # gate order i, f, g, o
            scale = 2.0 if gi == 2 else 1.0
            blocks.append(scale * a1[:, gi * H:(gi + 1) * H])
            blocks.append(scale * a2[:, gi * H:(gi + 1) * H])
        return jnp.concatenate(blocks, axis=1)

    w_in = interleave(wih1, jnp.zeros_like(wih1))            # x -> layer-1 gates
    b_in = interleave(b1, b2)
    w_rec_h1 = interleave(whh1, wih2)                        # rows for h1(t)
    w_rec_h2 = interleave(jnp.zeros_like(whh1), whh2)        # rows for h2(t-1)

    wpack = jnp.zeros((rows, 8 * H), jnp.float32)
    wpack = wpack.at[r_win:r_win + I, :].set(w_in)
    wpack = wpack.at[r_bin:r_bin + 1, :].set(b_in)
    wpack = wpack.at[r_wrec:r_wrec + H, :].set(w_rec_h1)
    wpack = wpack.at[r_wrec + H:r_wrec + 2 * H, :].set(w_rec_h2)
    wpack = wpack.at[r_wreg:r_wreg + H, 0:O].set(wreg)
    wpack = wpack.at[r_breg:r_breg + 1, 0:O].set(breg)
    return wpack


def lstm_reg_forward(x, wpack, hidden_size, output_size):
    """x: (S, B, I) float32.  wpack: output of pack_weights (built once).
    Returns (S*B, output_size) float32."""
    S, B, I = x.shape
    H, O = hidden_size, output_size
    x2d = x.reshape(S * B, I)      # free row-major reshape (rows t*B + b)

    kernel = functools.partial(_lstm_reg_kernel, seq_len=S, batch=B,
                               hidden_size=H, input_size=I, output_size=O)
    return pl.pallas_call(
        kernel,
        out_shape=jax.ShapeDtypeStruct((S * B, O), jnp.float32),
        in_specs=[pl.BlockSpec(memory_space=pltpu.MemorySpace.VMEM),
                  pl.BlockSpec(memory_space=pltpu.MemorySpace.VMEM)],
        out_specs=pl.BlockSpec(memory_space=pltpu.MemorySpace.VMEM),
        scratch_shapes=[pltpu.VMEM((S * B, H), jnp.float32)],
    )(x2d, wpack)


def make_params(key, input_size, hidden_size, output_size):
    """PyTorch-style uniform(-1/sqrt(H), 1/sqrt(H)) init.
    Weights pre-transposed to [K, 4H]; gate order i, f, g, o.
    Biases are the combined b_ih + b_hh of each layer."""
    H, I, O = hidden_size, input_size, output_size
    k = 1.0 / jnp.sqrt(jnp.float32(H))
    keys = jax.random.split(key, 8)
    u = lambda kk, shape: jax.random.uniform(kk, shape, jnp.float32, -k, k)
    wih1 = u(keys[0], (I, 4 * H))       # layer-1 W_ih^T
    whh1 = u(keys[1], (H, 4 * H))       # layer-1 W_hh^T
    b1 = u(keys[2], (1, 4 * H))         # b_ih + b_hh combined
    wih2 = u(keys[3], (H, 4 * H))       # layer-2 W_ih^T
    whh2 = u(keys[4], (H, 4 * H))       # layer-2 W_hh^T
    b2 = u(keys[5], (1, 4 * H))
    wreg = u(keys[6], (H, O))           # Linear weight^T
    breg = u(keys[7], (1, O))
    return (wih1, whh1, b1, wih2, whh2, b2, wreg, breg)


def lstm_reg_reference(x, params):
    """Pure-JAX reference of the same forward, for correctness checking."""
    wih1, whh1, b1, wih2, whh2, b2, wreg, breg = params
    H = whh1.shape[0]
    S, B, I = x.shape

    def cell(x_t, h, c, wih, whh, b):
        g = x_t @ wih + h @ whh + b
        i = jax.nn.sigmoid(g[:, 0 * H:1 * H])
        f = jax.nn.sigmoid(g[:, 1 * H:2 * H])
        gg = jnp.tanh(g[:, 2 * H:3 * H])
        o = jax.nn.sigmoid(g[:, 3 * H:4 * H])
        c = f * c + i * gg
        h = o * jnp.tanh(c)
        return h, c

    def step(carry, x_t):
        h1, c1, h2, c2 = carry
        h1, c1 = cell(x_t, h1, c1, wih1, whh1, b1)
        h2, c2 = cell(h1, h2, c2, wih2, whh2, b2)
        return (h1, c1, h2, c2), h2

    z = jnp.zeros((B, H), jnp.float32)
    _, hs = jax.lax.scan(step, (z, z, z, z), x)
    return (hs.reshape(S * B, H) @ wreg) + breg


if __name__ == "__main__":
    SEQ, BATCH = 8, 2
    INPUT_SIZE, HIDDEN_SIZE, OUTPUT_SIZE = 20 * 9, 8, 2

    key = jax.random.PRNGKey(0)
    kx, kp = jax.random.split(key)
    x = jax.random.normal(kx, (SEQ, BATCH, INPUT_SIZE), jnp.float32)
    params = make_params(kp, INPUT_SIZE, HIDDEN_SIZE, OUTPUT_SIZE)

    # Weight packing runs ONCE, outside the per-call hot path.
    wpack = jax.block_until_ready(pack_weights(params))

    out = lstm_reg_forward(x, wpack, HIDDEN_SIZE, OUTPUT_SIZE)
    out = jax.block_until_ready(out)

    ref = lstm_reg_reference(x, params)
    assert out.shape == (SEQ * BATCH, OUTPUT_SIZE), out.shape
    max_err = float(jnp.max(jnp.abs(out - ref)))
    # tanh is evaluated as 2*sigmoid(2x)-1 in-kernel -> tiny rounding delta.
    assert max_err < 1e-4, max_err

    print("KERNEL_OK")
</pallas_src>

<mosaic_0001>
module attributes {stable_mosaic.version = 11 : i64} {
  func.func @_lstm_reg_kernel(%arg0: memref<16x180xf32, #tpu.memory_space<vmem>>, %arg1: memref<224x64xf32, #tpu.memory_space<vmem>>, %arg2: memref<16x2xf32, #tpu.memory_space<vmem>>, %arg3: memref<16x8xf32, #tpu.memory_space<vmem>>) attributes {dimension_semantics = [], scalar_prefetch = 0 : i64, scratch_operands = 1 : i64, tpu.core_type = #tpu.core_type<tc>} {
    %c0 = arith.constant 0 : index
    %c0_0 = arith.constant 0 : index
    %0 = vector.load %arg1[%c0, %c0_0] : memref<224x64xf32, #tpu.memory_space<vmem>>, vector<180x64xf32>
    %c184 = arith.constant 184 : index
    %c0_1 = arith.constant 0 : index
    %1 = vector.load %arg1[%c184, %c0_1] : memref<224x64xf32, #tpu.memory_space<vmem>>, vector<1x64xf32>
    %c192 = arith.constant 192 : index
    %c0_2 = arith.constant 0 : index
    %2 = vector.load %arg1[%c192, %c0_2] : memref<224x64xf32, #tpu.memory_space<vmem>>, vector<16x64xf32>
    %c208 = arith.constant 208 : index
    %c0_3 = arith.constant 0 : index
    %3 = vector.load %arg1[%c208, %c0_3] : memref<224x64xf32, #tpu.memory_space<vmem>>, vector<8x2xf32>
    %c216 = arith.constant 216 : index
    %c0_4 = arith.constant 0 : index
    %4 = vector.load %arg1[%c216, %c0_4] : memref<224x64xf32, #tpu.memory_space<vmem>>, vector<1x2xf32>
    %c0_5 = arith.constant 0 : index
    %c0_6 = arith.constant 0 : index
    %5 = vector.load %arg0[%c0_5, %c0_6] : memref<16x180xf32, #tpu.memory_space<vmem>>, vector<16x180xf32>
    %cst = arith.constant dense<0.000000e+00> : vector<16x64xf32>
    %6 = tpu.matmul %5, %0, %cst {dimension_numbers = #tpu.dot_dimension_numbers<[1], [0], [0], [1], [0, 0, 1, 1], [], []>} : vector<16x180xf32>, vector<180x64xf32>, vector<16x64xf32> -> vector<16x64xf32>
    %7 = vector.broadcast %1 : vector<1x64xf32> to vector<16x64xf32>
    %8 = arith.addf %6, %7 : vector<16x64xf32>
    %9 = vector.extract_strided_slice %8 {offsets = [0, 0], sizes = [2, 64], strides = [1, 1]} : vector<16x64xf32> to vector<2x64xf32>
    %10 = arith.negf %9 : vector<2x64xf32>
    %11 = math.exp %10 : vector<2x64xf32>
    %cst_7 = arith.constant 1.000000e+00 : f32
    %12 = vector.broadcast %cst_7 : f32 to vector<2x64xf32>
    %13 = arith.addf %12, %11 : vector<2x64xf32>
    %14 = arith.divf %12, %13 : vector<2x64xf32>
    %15 = vector.extract_strided_slice %14 {offsets = [0, 0], sizes = [2, 16], strides = [1, 1]} : vector<2x64xf32> to vector<2x16xf32>
    %16 = vector.extract_strided_slice %14 {offsets = [0, 32], sizes = [2, 16], strides = [1, 1]} : vector<2x64xf32> to vector<2x16xf32>
    %cst_8 = arith.constant 2.000000e+00 : f32
    %17 = vector.broadcast %cst_8 : f32 to vector<2x16xf32>
    %18 = arith.mulf %17, %16 : vector<2x16xf32>
    %cst_9 = arith.constant 1.000000e+00 : f32
    %19 = vector.broadcast %cst_9 : f32 to vector<2x16xf32>
    %20 = arith.subf %18, %19 : vector<2x16xf32>
    %21 = vector.extract_strided_slice %14 {offsets = [0, 48], sizes = [2, 16], strides = [1, 1]} : vector<2x64xf32> to vector<2x16xf32>
    %22 = tpu.iota {dimensions = array<i32: 1>} : vector<2x16xi32>
    %c8_i32 = arith.constant 8 : i32
    %23 = vector.broadcast %c8_i32 : i32 to vector<2x16xi32>
    %24 = arith.cmpi slt, %22, %23 : vector<2x16xi32>
    %25 = arith.extui %24 : vector<2x16xi1> to vector<2x16xi32>
    %26 = arith.sitofp %25 : vector<2x16xi32> to vector<2x16xf32>
    %27 = arith.mulf %15, %20 : vector<2x16xf32>
    %28 = arith.mulf %26, %27 : vector<2x16xf32>
    %cst_10 = arith.constant 2.000000e+00 : f32
    %29 = vector.broadcast %cst_10 : f32 to vector<2x16xf32>
    %30 = arith.mulf %29, %28 : vector<2x16xf32>
    %31 = arith.negf %30 : vector<2x16xf32>
    %32 = math.exp %31 : vector<2x16xf32>
    %cst_11 = arith.constant 1.000000e+00 : f32
    %33 = vector.broadcast %cst_11 : f32 to vector<2x16xf32>
    %34 = arith.addf %33, %32 : vector<2x16xf32>
    %35 = arith.divf %33, %34 : vector<2x16xf32>
    %cst_12 = arith.constant 2.000000e+00 : f32
    %36 = vector.broadcast %cst_12 : f32 to vector<2x16xf32>
    %37 = arith.mulf %36, %35 : vector<2x16xf32>
    %cst_13 = arith.constant 1.000000e+00 : f32
    %38 = vector.broadcast %cst_13 : f32 to vector<2x16xf32>
    %39 = arith.subf %37, %38 : vector<2x16xf32>
    %40 = arith.mulf %21, %39 : vector<2x16xf32>
    %cst_14 = arith.constant dense<0.000000e+00> : vector<2x64xf32>
    %41 = tpu.matmul %40, %2, %cst_14 {dimension_numbers = #tpu.dot_dimension_numbers<[1], [0], [0], [1], [0, 0, 1, 1], [], []>} : vector<2x16xf32>, vector<16x64xf32>, vector<2x64xf32> -> vector<2x64xf32>
    %42 = vector.extract_strided_slice %8 {offsets = [2, 0], sizes = [2, 64], strides = [1, 1]} : vector<16x64xf32> to vector<2x64xf32>
    %43 = arith.addf %41, %42 : vector<2x64xf32>
    %44 = arith.negf %43 : vector<2x64xf32>
    %45 = math.exp %44 : vector<2x64xf32>
    %cst_15 = arith.constant 1.000000e+00 : f32
    %46 = vector.broadcast %cst_15 : f32 to vector<2x64xf32>
    %47 = arith.addf %46, %45 : vector<2x64xf32>
    %48 = arith.divf %46, %47 : vector<2x64xf32>
    %49 = vector.extract_strided_slice %48 {offsets = [0, 0], sizes = [2, 16], strides = [1, 1]} : vector<2x64xf32> to vector<2x16xf32>
    %50 = vector.extract_strided_slice %48 {offsets = [0, 16], sizes = [2, 16], strides = [1, 1]} : vector<2x64xf32> to vector<2x16xf32>
    %51 = vector.extract_strided_slice %48 {offsets = [0, 32], sizes = [2, 16], strides = [1, 1]} : vector<2x64xf32> to vector<2x16xf32>
    %cst_16 = arith.constant 2.000000e+00 : f32
    %52 = vector.broadcast %cst_16 : f32 to vector<2x16xf32>
    %53 = arith.mulf %52, %51 : vector<2x16xf32>
    %cst_17 = arith.constant 1.000000e+00 : f32
    %54 = vector.broadcast %cst_17 : f32 to vector<2x16xf32>
    %55 = arith.subf %53, %54 : vector<2x16xf32>
    %56 = vector.extract_strided_slice %48 {offsets = [0, 48], sizes = [2, 16], strides = [1, 1]} : vector<2x64xf32> to vector<2x16xf32>
    %57 = arith.mulf %50, %28 : vector<2x16xf32>
    %58 = arith.mulf %49, %55 : vector<2x16xf32>
    %59 = arith.addf %57, %58 : vector<2x16xf32>
    %cst_18 = arith.constant 2.000000e+00 : f32
    %60 = vector.broadcast %cst_18 : f32 to vector<2x16xf32>
    %61 = arith.mulf %60, %59 : vector<2x16xf32>
    %62 = arith.negf %61 : vector<2x16xf32>
    %63 = math.exp %62 : vector<2x16xf32>
    %cst_19 = arith.constant 1.000000e+00 : f32
    %64 = vector.broadcast %cst_19 : f32 to vector<2x16xf32>
    %65 = arith.addf %64, %63 : vector<2x16xf32>
    %66 = arith.divf %64, %65 : vector<2x16xf32>
    %cst_20 = arith.constant 2.000000e+00 : f32
    %67 = vector.broadcast %cst_20 : f32 to vector<2x16xf32>
    %68 = arith.mulf %67, %66 : vector<2x16xf32>
    %cst_21 = arith.constant 1.000000e+00 : f32
    %69 = vector.broadcast %cst_21 : f32 to vector<2x16xf32>
    %70 = arith.subf %68, %69 : vector<2x16xf32>
    %71 = arith.mulf %56, %70 : vector<2x16xf32>
    %72 = vector.extract_strided_slice %71 {offsets = [0, 8], sizes = [2, 8], strides = [1, 1]} : vector<2x16xf32> to vector<2x8xf32>
    %c0_22 = arith.constant 0 : index
    %c0_23 = arith.constant 0 : index
    %73 = vector.load %arg3[%c0_22, %c0_23] : memref<16x8xf32, #tpu.memory_space<vmem>>, vector<2x8xf32>
    tpu.vector_store %arg3[%c0_22, %c0_23], %72 {strides = array<i32>} : memref<16x8xf32, #tpu.memory_space<vmem>>, vector<2x8xf32>,
    %cst_24 = arith.constant dense<0.000000e+00> : vector<2x64xf32>
    %74 = tpu.matmul %71, %2, %cst_24 {dimension_numbers = #tpu.dot_dimension_numbers<[1], [0], [0], [1], [0, 0, 1, 1], [], []>} : vector<2x16xf32>, vector<16x64xf32>, vector<2x64xf32> -> vector<2x64xf32>
    %75 = vector.extract_strided_slice %8 {offsets = [4, 0], sizes = [2, 64], strides = [1, 1]} : vector<16x64xf32> to vector<2x64xf32>
    %76 = arith.addf %74, %75 : vector<2x64xf32>
    %77 = arith.negf %76 : vector<2x64xf32>
    %78 = math.exp %77 : vector<2x64xf32>
    %cst_25 = arith.constant 1.000000e+00 : f32
    %79 = vector.broadcast %cst_25 : f32 to vector<2x64xf32>
    %80 = arith.addf %79, %78 : vector<2x64xf32>
    %81 = arith.divf %79, %80 : vector<2x64xf32>
    %82 = vector.extract_strided_slice %81 {offsets = [0, 0], sizes = [2, 16], strides = [1, 1]} : vector<2x64xf32> to vector<2x16xf32>
    %83 = vector.extract_strided_slice %81 {offsets = [0, 16], sizes = [2, 16], strides = [1, 1]} : vector<2x64xf32> to vector<2x16xf32>
    %84 = vector.extract_strided_slice %81 {offsets = [0, 32], sizes = [2, 16], strides = [1, 1]} : vector<2x64xf32> to vector<2x16xf32>
    %cst_26 = arith.constant 2.000000e+00 : f32
    %85 = vector.broadcast %cst_26 : f32 to vector<2x16xf32>
    %86 = arith.mulf %85, %84 : vector<2x16xf32>
    %cst_27 = arith.constant 1.000000e+00 : f32
    %87 = vector.broadcast %cst_27 : f32 to vector<2x16xf32>
    %88 = arith.subf %86, %87 : vector<2x16xf32>
    %89 = vector.extract_strided_slice %81 {offsets = [0, 48], sizes = [2, 16], strides = [1, 1]} : vector<2x64xf32> to vector<2x16xf32>
    %90 = arith.mulf %83, %59 : vector<2x16xf32>
    %91 = arith.mulf %82, %88 : vector<2x16xf32>
    %92 = arith.addf %90, %91 : vector<2x16xf32>
    %cst_28 = arith.constant 2.000000e+00 : f32
    %93 = vector.broadcast %cst_28 : f32 to vector<2x16xf32>
    %94 = arith.mulf %93, %92 : vector<2x16xf32>
    %95 = arith.negf %94 : vector<2x16xf32>
    %96 = math.exp %95 : vector<2x16xf32>
    %cst_29 = arith.constant 1.000000e+00 : f32
    %97 = vector.broadcast %cst_29 : f32 to vector<2x16xf32>
    %98 = arith.addf %97, %96 : vector<2x16xf32>
    %99 = arith.divf %97, %98 : vector<2x16xf32>
    %cst_30 = arith.constant 2.000000e+00 : f32
    %100 = vector.broadcast %cst_30 : f32 to vector<2x16xf32>
    %101 = arith.mulf %100, %99 : vector<2x16xf32>
    %cst_31 = arith.constant 1.000000e+00 : f32
    %102 = vector.broadcast %cst_31 : f32 to vector<2x16xf32>
    %103 = arith.subf %101, %102 : vector<2x16xf32>
    %104 = arith.mulf %89, %103 : vector<2x16xf32>
    %105 = vector.extract_strided_slice %104 {offsets = [0, 8], sizes = [2, 8], strides = [1, 1]} : vector<2x16xf32> to vector<2x8xf32>
    %c2 = arith.constant 2 : index
    %c0_32 = arith.constant 0 : index
    %106 = vector.load %arg3[%c2, %c0_32] : memref<16x8xf32, #tpu.memory_space<vmem>>, vector<2x8xf32>
    tpu.vector_store %arg3[%c2, %c0_32], %105 {strides = array<i32>} : memref<16x8xf32, #tpu.memory_space<vmem>>, vector<2x8xf32>,
    %cst_33 = arith.constant dense<0.000000e+00> : vector<2x64xf32>
    %107 = tpu.matmul %104, %2, %cst_33 {dimension_numbers = #tpu.dot_dimension_numbers<[1], [0], [0], [1], [0, 0, 1, 1], [], []>} : vector<2x16xf32>, vector<16x64xf32>, vector<2x64xf32> -> vector<2x64xf32>
    %108 = vector.extract_strided_slice %8 {offsets = [6, 0], sizes = [2, 64], strides = [1, 1]} : vector<16x64xf32> to vector<2x64xf32>
    %109 = arith.addf %107, %108 : vector<2x64xf32>
    %110 = arith.negf %109 : vector<2x64xf32>
    %111 = math.exp %110 : vector<2x64xf32>
    %cst_34 = arith.constant 1.000000e+00 : f32
    %112 = vector.broadcast %cst_34 : f32 to vector<2x64xf32>
    %113 = arith.addf %112, %111 : vector<2x64xf32>
    %114 = arith.divf %112, %113 : vector<2x64xf32>
    %115 = vector.extract_strided_slice %114 {offsets = [0, 0], sizes = [2, 16], strides = [1, 1]} : vector<2x64xf32> to vector<2x16xf32>
    %116 = vector.extract_strided_slice %114 {offsets = [0, 16], sizes = [2, 16], strides = [1, 1]} : vector<2x64xf32> to vector<2x16xf32>
    %117 = vector.extract_strided_slice %114 {offsets = [0, 32], sizes = [2, 16], strides = [1, 1]} : vector<2x64xf32> to vector<2x16xf32>
    %cst_35 = arith.constant 2.000000e+00 : f32
    %118 = vector.broadcast %cst_35 : f32 to vector<2x16xf32>
    %119 = arith.mulf %118, %117 : vector<2x16xf32>
    %cst_36 = arith.constant 1.000000e+00 : f32
    %120 = vector.broadcast %cst_36 : f32 to vector<2x16xf32>
    %121 = arith.subf %119, %120 : vector<2x16xf32>
    %122 = vector.extract_strided_slice %114 {offsets = [0, 48], sizes = [2, 16], strides = [1, 1]} : vector<2x64xf32> to vector<2x16xf32>
    %123 = arith.mulf %116, %92 : vector<2x16xf32>
    %124 = arith.mulf %115, %121 : vector<2x16xf32>
    %125 = arith.addf %123, %124 : vector<2x16xf32>
    %cst_37 = arith.constant 2.000000e+00 : f32
    %126 = vector.broadcast %cst_37 : f32 to vector<2x16xf32>
    %127 = arith.mulf %126, %125 : vector<2x16xf32>
    %128 = arith.negf %127 : vector<2x16xf32>
    %129 = math.exp %128 : vector<2x16xf32>
    %cst_38 = arith.constant 1.000000e+00 : f32
    %130 = vector.broadcast %cst_38 : f32 to vector<2x16xf32>
    %131 = arith.addf %130, %129 : vector<2x16xf32>
    %132 = arith.divf %130, %131 : vector<2x16xf32>
    %cst_39 = arith.constant 2.000000e+00 : f32
    %133 = vector.broadcast %cst_39 : f32 to vector<2x16xf32>
    %134 = arith.mulf %133, %132 : vector<2x16xf32>
    %cst_40 = arith.constant 1.000000e+00 : f32
    %135 = vector.broadcast %cst_40 : f32 to vector<2x16xf32>
    %136 = arith.subf %134, %135 : vector<2x16xf32>
    %137 = arith.mulf %122, %136 : vector<2x16xf32>
    %138 = vector.extract_strided_slice %137 {offsets = [0, 8], sizes = [2, 8], strides = [1, 1]} : vector<2x16xf32> to vector<2x8xf32>
    %c4 = arith.constant 4 : index
    %c0_41 = arith.constant 0 : index
    %139 = vector.load %arg3[%c4, %c0_41] : memref<16x8xf32, #tpu.memory_space<vmem>>, vector<2x8xf32>
    tpu.vector_store %arg3[%c4, %c0_41], %138 {strides = array<i32>} : memref<16x8xf32, #tpu.memory_space<vmem>>, vector<2x8xf32>,
    %cst_42 = arith.constant dense<0.000000e+00> : vector<2x64xf32>
    %140 = tpu.matmul %137, %2, %cst_42 {dimension_numbers = #tpu.dot_dimension_numbers<[1], [0], [0], [1], [0, 0, 1, 1], [], []>} : vector<2x16xf32>, vector<16x64xf32>, vector<2x64xf32> -> vector<2x64xf32>
    %141 = vector.extract_strided_slice %8 {offsets = [8, 0], sizes = [2, 64], strides = [1, 1]} : vector<16x64xf32> to vector<2x64xf32>
    %142 = arith.addf %140, %141 : vector<2x64xf32>
    %143 = arith.negf %142 : vector<2x64xf32>
    %144 = math.exp %143 : vector<2x64xf32>
    %cst_43 = arith.constant 1.000000e+00 : f32
    %145 = vector.broadcast %cst_43 : f32 to vector<2x64xf32>
    %146 = arith.addf %145, %144 : vector<2x64xf32>
    %147 = arith.divf %145, %146 : vector<2x64xf32>
    %148 = vector.extract_strided_slice %147 {offsets = [0, 0], sizes = [2, 16], strides = [1, 1]} : vector<2x64xf32> to vector<2x16xf32>
    %149 = vector.extract_strided_slice %147 {offsets = [0, 16], sizes = [2, 16], strides = [1, 1]} : vector<2x64xf32> to vector<2x16xf32>
    %150 = vector.extract_strided_slice %147 {offsets = [0, 32], sizes = [2, 16], strides = [1, 1]} : vector<2x64xf32> to vector<2x16xf32>
    %cst_44 = arith.constant 2.000000e+00 : f32
    %151 = vector.broadcast %cst_44 : f32 to vector<2x16xf32>
    %152 = arith.mulf %151, %150 : vector<2x16xf32>
    %cst_45 = arith.constant 1.000000e+00 : f32
    %153 = vector.broadcast %cst_45 : f32 to vector<2x16xf32>
    %154 = arith.subf %152, %153 : vector<2x16xf32>
    %155 = vector.extract_strided_slice %147 {offsets = [0, 48], sizes = [2, 16], strides = [1, 1]} : vector<2x64xf32> to vector<2x16xf32>
    %156 = arith.mulf %149, %125 : vector<2x16xf32>
    %157 = arith.mulf %148, %154 : vector<2x16xf32>
    %158 = arith.addf %156, %157 : vector<2x16xf32>
    %cst_46 = arith.constant 2.000000e+00 : f32
    %159 = vector.broadcast %cst_46 : f32 to vector<2x16xf32>
    %160 = arith.mulf %159, %158 : vector<2x16xf32>
    %161 = arith.negf %160 : vector<2x16xf32>
    %162 = math.exp %161 : vector<2x16xf32>
    %cst_47 = arith.constant 1.000000e+00 : f32
    %163 = vector.broadcast %cst_47 : f32 to vector<2x16xf32>
    %164 = arith.addf %163, %162 : vector<2x16xf32>
    %165 = arith.divf %163, %164 : vector<2x16xf32>
    %cst_48 = arith.constant 2.000000e+00 : f32
    %166 = vector.broadcast %cst_48 : f32 to vector<2x16xf32>
    %167 = arith.mulf %166, %165 : vector<2x16xf32>
    %cst_49 = arith.constant 1.000000e+00 : f32
    %168 = vector.broadcast %cst_49 : f32 to vector<2x16xf32>
    %169 = arith.subf %167, %168 : vector<2x16xf32>
    %170 = arith.mulf %155, %169 : vector<2x16xf32>
    %171 = vector.extract_strided_slice %170 {offsets = [0, 8], sizes = [2, 8], strides = [1, 1]} : vector<2x16xf32> to vector<2x8xf32>
    %c6 = arith.constant 6 : index
    %c0_50 = arith.constant 0 : index
    %172 = vector.load %arg3[%c6, %c0_50] : memref<16x8xf32, #tpu.memory_space<vmem>>, vector<2x8xf32>
    tpu.vector_store %arg3[%c6, %c0_50], %171 {strides = array<i32>} : memref<16x8xf32, #tpu.memory_space<vmem>>, vector<2x8xf32>,
    %cst_51 = arith.constant dense<0.000000e+00> : vector<2x64xf32>
    %173 = tpu.matmul %170, %2, %cst_51 {dimension_numbers = #tpu.dot_dimension_numbers<[1], [0], [0], [1], [0, 0, 1, 1], [], []>} : vector<2x16xf32>, vector<16x64xf32>, vector<2x64xf32> -> vector<2x64xf32>
    %174 = vector.extract_strided_slice %8 {offsets = [10, 0], sizes = [2, 64], strides = [1, 1]} : vector<16x64xf32> to vector<2x64xf32>
    %175 = arith.addf %173, %174 : vector<2x64xf32>
    %176 = arith.negf %175 : vector<2x64xf32>
    %177 = math.exp %176 : vector<2x64xf32>
    %cst_52 = arith.constant 1.000000e+00 : f32
    %178 = vector.broadcast %cst_52 : f32 to vector<2x64xf32>
    %179 = arith.addf %178, %177 : vector<2x64xf32>
    %180 = arith.divf %178, %179 : vector<2x64xf32>
    %181 = vector.extract_strided_slice %180 {offsets = [0, 0], sizes = [2, 16], strides = [1, 1]} : vector<2x64xf32> to vector<2x16xf32>
    %182 = vector.extract_strided_slice %180 {offsets = [0, 16], sizes = [2, 16], strides = [1, 1]} : vector<2x64xf32> to vector<2x16xf32>
    %183 = vector.extract_strided_slice %180 {offsets = [0, 32], sizes = [2, 16], strides = [1, 1]} : vector<2x64xf32> to vector<2x16xf32>
    %cst_53 = arith.constant 2.000000e+00 : f32
    %184 = vector.broadcast %cst_53 : f32 to vector<2x16xf32>
    %185 = arith.mulf %184, %183 : vector<2x16xf32>
    %cst_54 = arith.constant 1.000000e+00 : f32
    %186 = vector.broadcast %cst_54 : f32 to vector<2x16xf32>
    %187 = arith.subf %185, %186 : vector<2x16xf32>
    %188 = vector.extract_strided_slice %180 {offsets = [0, 48], sizes = [2, 16], strides = [1, 1]} : vector<2x64xf32> to vector<2x16xf32>
    %189 = arith.mulf %182, %158 : vector<2x16xf32>
    %190 = arith.mulf %181, %187 : vector<2x16xf32>
    %191 = arith.addf %189, %190 : vector<2x16xf32>
    %cst_55 = arith.constant 2.000000e+00 : f32
    %192 = vector.broadcast %cst_55 : f32 to vector<2x16xf32>
    %193 = arith.mulf %192, %191 : vector<2x16xf32>
    %194 = arith.negf %193 : vector<2x16xf32>
    %195 = math.exp %194 : vector<2x16xf32>
    %cst_56 = arith.constant 1.000000e+00 : f32
    %196 = vector.broadcast %cst_56 : f32 to vector<2x16xf32>
    %197 = arith.addf %196, %195 : vector<2x16xf32>
    %198 = arith.divf %196, %197 : vector<2x16xf32>
    %cst_57 = arith.constant 2.000000e+00 : f32
    %199 = vector.broadcast %cst_57 : f32 to vector<2x16xf32>
    %200 = arith.mulf %199, %198 : vector<2x16xf32>
    %cst_58 = arith.constant 1.000000e+00 : f32
    %201 = vector.broadcast %cst_58 : f32 to vector<2x16xf32>
    %202 = arith.subf %200, %201 : vector<2x16xf32>
    %203 = arith.mulf %188, %202 : vector<2x16xf32>
    %204 = vector.extract_strided_slice %203 {offsets = [0, 8], sizes = [2, 8], strides = [1, 1]} : vector<2x16xf32> to vector<2x8xf32>
    %c8 = arith.constant 8 : index
    %c0_59 = arith.constant 0 : index
    %205 = vector.load %arg3[%c8, %c0_59] : memref<16x8xf32, #tpu.memory_space<vmem>>, vector<2x8xf32>
    tpu.vector_store %arg3[%c8, %c0_59], %204 {strides = array<i32>} : memref<16x8xf32, #tpu.memory_space<vmem>>, vector<2x8xf32>,
    %cst_60 = arith.constant dense<0.000000e+00> : vector<2x64xf32>
    %206 = tpu.matmul %203, %2, %cst_60 {dimension_numbers = #tpu.dot_dimension_numbers<[1], [0], [0], [1], [0, 0, 1, 1], [], []>} : vector<2x16xf32>, vector<16x64xf32>, vector<2x64xf32> -> vector<2x64xf32>
    %207 = vector.extract_strided_slice %8 {offsets = [12, 0], sizes = [2, 64], strides = [1, 1]} : vector<16x64xf32> to vector<2x64xf32>
    %208 = arith.addf %206, %207 : vector<2x64xf32>
    %209 = arith.negf %208 : vector<2x64xf32>
    %210 = math.exp %209 : vector<2x64xf32>
    %cst_61 = arith.constant 1.000000e+00 : f32
    %211 = vector.broadcast %cst_61 : f32 to vector<2x64xf32>
    %212 = arith.addf %211, %210 : vector<2x64xf32>
    %213 = arith.divf %211, %212 : vector<2x64xf32>
    %214 = vector.extract_strided_slice %213 {offsets = [0, 0], sizes = [2, 16], strides = [1, 1]} : vector<2x64xf32> to vector<2x16xf32>
    %215 = vector.extract_strided_slice %213 {offsets = [0, 16], sizes = [2, 16], strides = [1, 1]} : vector<2x64xf32> to vector<2x16xf32>
    %216 = vector.extract_strided_slice %213 {offsets = [0, 32], sizes = [2, 16], strides = [1, 1]} : vector<2x64xf32> to vector<2x16xf32>
    %cst_62 = arith.constant 2.000000e+00 : f32
    %217 = vector.broadcast %cst_62 : f32 to vector<2x16xf32>
    %218 = arith.mulf %217, %216 : vector<2x16xf32>
    %cst_63 = arith.constant 1.000000e+00 : f32
    %219 = vector.broadcast %cst_63 : f32 to vector<2x16xf32>
    %220 = arith.subf %218, %219 : vector<2x16xf32>
    %221 = vector.extract_strided_slice %213 {offsets = [0, 48], sizes = [2, 16], strides = [1, 1]} : vector<2x64xf32> to vector<2x16xf32>
    %222 = arith.mulf %215, %191 : vector<2x16xf32>
    %223 = arith.mulf %214, %220 : vector<2x16xf32>
    %224 = arith.addf %222, %223 : vector<2x16xf32>
    %cst_64 = arith.constant 2.000000e+00 : f32
    %225 = vector.broadcast %cst_64 : f32 to vector<2x16xf32>
    %226 = arith.mulf %225, %224 : vector<2x16xf32>
    %227 = arith.negf %226 : vector<2x16xf32>
    %228 = math.exp %227 : vector<2x16xf32>
    %cst_65 = arith.constant 1.000000e+00 : f32
    %229 = vector.broadcast %cst_65 : f32 to vector<2x16xf32>
    %230 = arith.addf %229, %228 : vector<2x16xf32>
    %231 = arith.divf %229, %230 : vector<2x16xf32>
    %cst_66 = arith.constant 2.000000e+00 : f32
    %232 = vector.broadcast %cst_66 : f32 to vector<2x16xf32>
    %233 = arith.mulf %232, %231 : vector<2x16xf32>
    %cst_67 = arith.constant 1.000000e+00 : f32
    %234 = vector.broadcast %cst_67 : f32 to vector<2x16xf32>
    %235 = arith.subf %233, %234 : vector<2x16xf32>
    %236 = arith.mulf %221, %235 : vector<2x16xf32>
    %237 = vector.extract_strided_slice %236 {offsets = [0, 8], sizes = [2, 8], strides = [1, 1]} : vector<2x16xf32> to vector<2x8xf32>
    %c10 = arith.constant 10 : index
    %c0_68 = arith.constant 0 : index
    %238 = vector.load %arg3[%c10, %c0_68] : memref<16x8xf32, #tpu.memory_space<vmem>>, vector<2x8xf32>
    tpu.vector_store %arg3[%c10, %c0_68], %237 {strides = array<i32>} : memref<16x8xf32, #tpu.memory_space<vmem>>, vector<2x8xf32>,
    %cst_69 = arith.constant dense<0.000000e+00> : vector<2x64xf32>
    %239 = tpu.matmul %236, %2, %cst_69 {dimension_numbers = #tpu.dot_dimension_numbers<[1], [0], [0], [1], [0, 0, 1, 1], [], []>} : vector<2x16xf32>, vector<16x64xf32>, vector<2x64xf32> -> vector<2x64xf32>
    %240 = vector.extract_strided_slice %8 {offsets = [14, 0], sizes = [2, 64], strides = [1, 1]} : vector<16x64xf32> to vector<2x64xf32>
    %241 = arith.addf %239, %240 : vector<2x64xf32>
    %242 = arith.negf %241 : vector<2x64xf32>
    %243 = math.exp %242 : vector<2x64xf32>
    %cst_70 = arith.constant 1.000000e+00 : f32
    %244 = vector.broadcast %cst_70 : f32 to vector<2x64xf32>
    %245 = arith.addf %244, %243 : vector<2x64xf32>
    %246 = arith.divf %244, %245 : vector<2x64xf32>
    %247 = vector.extract_strided_slice %246 {offsets = [0, 0], sizes = [2, 16], strides = [1, 1]} : vector<2x64xf32> to vector<2x16xf32>
    %248 = vector.extract_strided_slice %246 {offsets = [0, 16], sizes = [2, 16], strides = [1, 1]} : vector<2x64xf32> to vector<2x16xf32>
    %249 = vector.extract_strided_slice %246 {offsets = [0, 32], sizes = [2, 16], strides = [1, 1]} : vector<2x64xf32> to vector<2x16xf32>
    %cst_71 = arith.constant 2.000000e+00 : f32
    %250 = vector.broadcast %cst_71 : f32 to vector<2x16xf32>
    %251 = arith.mulf %250, %249 : vector<2x16xf32>
    %cst_72 = arith.constant 1.000000e+00 : f32
    %252 = vector.broadcast %cst_72 : f32 to vector<2x16xf32>
    %253 = arith.subf %251, %252 : vector<2x16xf32>
    %254 = vector.extract_strided_slice %246 {offsets = [0, 48], sizes = [2, 16], strides = [1, 1]} : vector<2x64xf32> to vector<2x16xf32>
    %255 = arith.mulf %248, %224 : vector<2x16xf32>
    %256 = arith.mulf %247, %253 : vector<2x16xf32>
    %257 = arith.addf %255, %256 : vector<2x16xf32>
    %cst_73 = arith.constant 2.000000e+00 : f32
    %258 = vector.broadcast %cst_73 : f32 to vector<2x16xf32>
    %259 = arith.mulf %258, %257 : vector<2x16xf32>
    %260 = arith.negf %259 : vector<2x16xf32>
    %261 = math.exp %260 : vector<2x16xf32>
    %cst_74 = arith.constant 1.000000e+00 : f32
    %262 = vector.broadcast %cst_74 : f32 to vector<2x16xf32>
    %263 = arith.addf %262, %261 : vector<2x16xf32>
    %264 = arith.divf %262, %263 : vector<2x16xf32>
    %cst_75 = arith.constant 2.000000e+00 : f32
    %265 = vector.broadcast %cst_75 : f32 to vector<2x16xf32>
    %266 = arith.mulf %265, %264 : vector<2x16xf32>
    %cst_76 = arith.constant 1.000000e+00 : f32
    %267 = vector.broadcast %cst_76 : f32 to vector<2x16xf32>
    %268 = arith.subf %266, %267 : vector<2x16xf32>
    %269 = arith.mulf %254, %268 : vector<2x16xf32>
    %270 = vector.extract_strided_slice %269 {offsets = [0, 8], sizes = [2, 8], strides = [1, 1]} : vector<2x16xf32> to vector<2x8xf32>
    %c12 = arith.constant 12 : index
    %c0_77 = arith.constant 0 : index
    %271 = vector.load %arg3[%c12, %c0_77] : memref<16x8xf32, #tpu.memory_space<vmem>>, vector<2x8xf32>
    tpu.vector_store %arg3[%c12, %c0_77], %270 {strides = array<i32>} : memref<16x8xf32, #tpu.memory_space<vmem>>, vector<2x8xf32>,
    %cst_78 = arith.constant dense<0.000000e+00> : vector<2x64xf32>
    %272 = tpu.matmul %269, %2, %cst_78 {dimension_numbers = #tpu.dot_dimension_numbers<[1], [0], [0], [1], [0, 0, 1, 1], [], []>} : vector<2x16xf32>, vector<16x64xf32>, vector<2x64xf32> -> vector<2x64xf32>
    %273 = vector.broadcast %1 : vector<1x64xf32> to vector<2x64xf32>
    %274 = arith.addf %272, %273 : vector<2x64xf32>
    %275 = arith.negf %274 : vector<2x64xf32>
    %276 = math.exp %275 : vector<2x64xf32>
    %cst_79 = arith.constant 1.000000e+00 : f32
    %277 = vector.broadcast %cst_79 : f32 to vector<2x64xf32>
    %278 = arith.addf %277, %276 : vector<2x64xf32>
    %279 = arith.divf %277, %278 : vector<2x64xf32>
    %280 = vector.extract_strided_slice %279 {offsets = [0, 0], sizes = [2, 16], strides = [1, 1]} : vector<2x64xf32> to vector<2x16xf32>
    %281 = vector.extract_strided_slice %279 {offsets = [0, 16], sizes = [2, 16], strides = [1, 1]} : vector<2x64xf32> to vector<2x16xf32>
    %282 = vector.extract_strided_slice %279 {offsets = [0, 32], sizes = [2, 16], strides = [1, 1]} : vector<2x64xf32> to vector<2x16xf32>
    %cst_80 = arith.constant 2.000000e+00 : f32
    %283 = vector.broadcast %cst_80 : f32 to vector<2x16xf32>
    %284 = arith.mulf %283, %282 : vector<2x16xf32>
    %cst_81 = arith.constant 1.000000e+00 : f32
    %285 = vector.broadcast %cst_81 : f32 to vector<2x16xf32>
    %286 = arith.subf %284, %285 : vector<2x16xf32>
    %287 = vector.extract_strided_slice %279 {offsets = [0, 48], sizes = [2, 16], strides = [1, 1]} : vector<2x64xf32> to vector<2x16xf32>
    %288 = arith.mulf %281, %257 : vector<2x16xf32>
    %289 = arith.mulf %280, %286 : vector<2x16xf32>
    %290 = arith.addf %288, %289 : vector<2x16xf32>
    %cst_82 = arith.constant 2.000000e+00 : f32
    %291 = vector.broadcast %cst_82 : f32 to vector<2x16xf32>
    %292 = arith.mulf %291, %290 : vector<2x16xf32>
    %293 = arith.negf %292 : vector<2x16xf32>
    %294 = math.exp %293 : vector<2x16xf32>
    %cst_83 = arith.constant 1.000000e+00 : f32
    %295 = vector.broadcast %cst_83 : f32 to vector<2x16xf32>
    %296 = arith.addf %295, %294 : vector<2x16xf32>
    %297 = arith.divf %295, %296 : vector<2x16xf32>
    %cst_84 = arith.constant 2.000000e+00 : f32
    %298 = vector.broadcast %cst_84 : f32 to vector<2x16xf32>
    %299 = arith.mulf %298, %297 : vector<2x16xf32>
    %cst_85 = arith.constant 1.000000e+00 : f32
    %300 = vector.broadcast %cst_85 : f32 to vector<2x16xf32>
    %301 = arith.subf %299, %300 : vector<2x16xf32>
    %302 = arith.mulf %287, %301 : vector<2x16xf32>
    %303 = vector.extract_strided_slice %302 {offsets = [0, 8], sizes = [2, 8], strides = [1, 1]} : vector<2x16xf32> to vector<2x8xf32>
    %c14 = arith.constant 14 : index
    %c0_86 = arith.constant 0 : index
    %304 = vector.load %arg3[%c14, %c0_86] : memref<16x8xf32, #tpu.memory_space<vmem>>, vector<2x8xf32>
    tpu.vector_store %arg3[%c14, %c0_86], %303 {strides = array<i32>} : memref<16x8xf32, #tpu.memory_space<vmem>>, vector<2x8xf32>,
    %c0_87 = arith.constant 0 : index
    %c0_88 = arith.constant 0 : index
    %305 = vector.load %arg3[%c0_87, %c0_88] : memref<16x8xf32, #tpu.memory_space<vmem>>, vector<16x8xf32>
    %cst_89 = arith.constant dense<0.000000e+00> : vector<16x2xf32>
    %306 = tpu.matmul %305, %3, %cst_89 {dimension_numbers = #tpu.dot_dimension_numbers<[1], [0], [0], [1], [0, 0, 1, 1], [], []>} : vector<16x8xf32>, vector<8x2xf32>, vector<16x2xf32> -> vector<16x2xf32>
    %307 = vector.broadcast %4 : vector<1x2xf32> to vector<16x2xf32>
    %308 = arith.addf %306, %307 : vector<16x2xf32>
    %c0_90 = arith.constant 0 : index
    %c0_91 = arith.constant 0 : index
    %309 = vector.load %arg2[%c0_90, %c0_91] : memref<16x2xf32, #tpu.memory_space<vmem>>, vector<16x2xf32>
    tpu.vector_store %arg2[%c0_90, %c0_91], %308 {strides = array<i32>} : memref<16x2xf32, #tpu.memory_space<vmem>>, vector<16x2xf32>,
    return
  }
}

</mosaic_0001>

<bundles_post_ra>
// kernel: tpu_custom_call.1
= control target key start
LH: loop header
LB: loop body
LE: loop exit
PB: predicated region body
PF: predicated region fallthrough
CT: control target
= control target key end

     0   :  { %v1456_v0 = vmov 0.0|0.0   ;;  %vm47_vm0 = vcmask 424960   ;;  %v1457_v35 = vmov 0.0   ;;  %vm54_vm1 = vcmask 1043456   ;;  %s1458_s5 = smov 96   ;;  %s1460_s10 = smov 48   ;;  %s1730_s1 = inlined_call_operand.vmem [shape: f32[224,64], index: 1, kind: input, shape index: {}]   ;;  %s1731_s0 = inlined_call_operand.vmem [shape: f32[16,180], index: 0, kind: input, shape index: {}]   ;;  %s1732_s2 = inlined_call_operand.vmem [shape: f32[16,2], index: 2, kind: output, shape index: {}]  }
   0x1   :  { %1318 = vmatprep.subr.bf16.mxu0 %v1456_v0  ;;  %v11_v1 = vld [vmem:[%s1730_s1] sm:$0xff]  ;;  %v12_v2 = vld [vmem:[%s1730_s1 + $0x8] sm:$0xff]  ;;  %v13_v3 = vld [vmem:[%s1730_s1 + $0x10] sm:$0xff]  ;;  %1351 = vmatprep.subr.bf16.mxu1 %v1456_v0  ;;  %v141_v48 = vlaneseq  ;;  %vm1459_vm3 = vmmov 0   ;;  %s1461_s11 = smov 16   ;;  %s1462_s12 = smov 80  }
   0x2   :  { %v1319_v4 = vpack.c.bf16 %v12_v2, %v11_v1  ;;  %v14_v5 = vld [vmem:[%s1730_s1 + $0x18] sm:$0xff]  ;;  %v15_v7 = vld [vmem:[%s1730_s1 + $0x20] sm:$0xff]  ;;  %v16_v8 = vld [vmem:[%s1730_s1 + $0x28] sm:$0xff]  ;;  %1261 = vmatprep.mubr.msk.f32.mxu1 %vm1459_vm3, %v1457_v35  ;;  %vm172_vm4 = vcmask 130048   ;;  %s1463_s13 = smov 32   ;;  %vm286_vm5 = vcmask 58368  }
   0x3   :  { %v1322_v6 = vpack.c.bf16 %v14_v5, %v13_v3  ;;  %v1325_v9 = vpack.c.bf16 %v16_v8, %v15_v7  ;;  %v40_v10 = vld [vmem:[%s1731_s0 + $0x8] sm:$0xff]  ;;  %v17_v11 = vld [vmem:[%s1730_s1 + $0x30] sm:$0xff]  ;;  %v18_v12 = vld [vmem:[%s1730_s1 + $0x38] sm:$0xff]  ;;  %v142_v49 = vand.u32 127, %v141_v48  ;;  %vm1089_vm6 = vcmask 64512  }
   0x4   :  { %1320 = vmatpush1.bf16.msra.mxu0 %v1319_v4  ;;  %1180 = vmatprep.mubr.msk.f32.mxu0 %vm47_vm0, %v40_v10  ;;  %v1328_v13 = vpack.c.bf16 %v18_v12, %v17_v11  ;;  %v19_v14 = vld [vmem:[%s1730_s1 + $0x40] sm:$0xff]  ;;  %v20_v15 = vld [vmem:[%s1730_s1 + $0x48] sm:$0xff]  ;;  %v21_v17 = vld [vmem:[%s1730_s1 + $0x50] sm:$0xff]  ;;  %vm1171_vm7 = vcmask 15360  }
   0x5   :  { %1321 = vmatprep.subr.bf16.mxu0 %v1456_v0  ;;  %v1331_v16 = vpack.c.bf16 %v20_v15, %v19_v14  ;;  %v22_v18 = vld [vmem:[%s1730_s1 + $0x58] sm:$0xff]  ;;  %v23_v20 = vld [vmem:[%s1730_s1 + $0x60] sm:$0xff]  ;;  %v24_v21 = vld [vmem:[%s1730_s1 + $0x68] sm:$0xff]  ;;  %vm143_vm2 = vcmp.lt.s32.totalorder %v142_v49, 8 }
   0x6   :  { %v1334_v19 = vpack.c.bf16 %v22_v18, %v21_v17  ;;  %v1337_v22 = vpack.c.bf16 %v24_v21, %v23_v20  ;;  %v25_v23 = vld [vmem:[%s1730_s1 + $0x70] sm:$0xff]  ;;  %v26_v24 = vld [vmem:[%s1730_s1 + $0x78] sm:$0xff]  ;;  %v27_v26 = vld [vmem:[%s1730_s1 + $0x80] sm:$0xff]  ;;  %v1184_v50 = vsel %vm143_vm2, 1.0, %v1457_v35 }
   0x7   :  { %v1340_v25 = vpack.c.bf16 %v26_v24, %v25_v23  ;;  %v28_v27 = vld [vmem:[%s1730_s1 + $0x88] sm:$0xff]  ;;  %v29_v29 = vld [vmem:[%s1730_s1 + $0x90] sm:$0xff]  ;;  %v30_v30 = vld [vmem:[%s1730_s1 + $0x98] sm:$0xff] }
   0x8   :  { %1323 = vmatpush1.bf16.msra.mxu0 %v1322_v6  ;;  %v1343_v28 = vpack.c.bf16 %v28_v27, %v27_v26  ;;  %v1346_v31 = vpack.c.bf16 %v30_v30, %v29_v29  ;;  %v31_v32 = vld [vmem:[%s1730_s1 + $0xa0] sm:$0xff]  ;;  %v32_v33 = vld [vmem:[%s1730_s1 + $0xa8] sm:$0xff]  ;;  %v33_v36 = vld [vmem:[%s1730_s1 + $0xb0] sm:$0xf] }
   0x9   :  { %1324 = vmatprep.subr.bf16.mxu0 %v1456_v0  ;;  %v1349_v34 = vpack.c.bf16 %v32_v33, %v31_v32  ;;  %v39_v37 = vld [vmem:[%s1731_s0] sm:$0xff]  ;;  %v1572_v38 = vld [vmem:[%s1730_s1 + $0xb8] ss:$0 sm:$0xff]  ;;  %v36_v59 = vld [vmem:[%s1730_s1 + $0xc8] sm:$0xff] }
   0xa   :  { %v35_v58 = vld [vmem:[%s1730_s1 + $0xc0] sm:$0xff] }
   0xb   :  { %v1586_v60 = vpack.c.bf16 %v36_v59, %v35_v58 }
   0xc   :  { %1326 = vmatpush1.bf16.msra.mxu0 %v1325_v9 }
   0xd   :  { %1327 = vmatprep.subr.bf16.mxu0 %v1456_v0  ;;  %1353 = vmatpush3.bf16.msra.mxu1 %v1586_v60 }
   0xe   :  { %1354 = vmatprep.subr.bf16.mxu1 %v1456_v0 }
  0x10   :  { %1329 = vmatpush1.bf16.msra.mxu0 %v1328_v13 }
  0x11   :  { %1330 = vmatprep.subr.bf16.mxu0 %v1456_v0 }
  0x14   :  { %1332 = vmatpush1.bf16.msra.mxu0 %v1331_v16 }
  0x15   :  { %1333 = vmatprep.subr.bf16.mxu0 %v1456_v0 }
  0x18   :  { %1335 = vmatpush1.bf16.msra.mxu0 %v1334_v19 }
  0x19   :  { %1336 = vmatprep.subr.bf16.mxu0 %v1456_v0 }
  0x1c   :  { %1338 = vmatpush1.bf16.msra.mxu0 %v1337_v22 }
  0x1d   :  { %1339 = vmatprep.subr.bf16.mxu0 %v1456_v0 }
  0x20   :  { %1341 = vmatpush1.bf16.msra.mxu0 %v1340_v25 }
  0x21   :  { %1342 = vmatprep.subr.bf16.mxu0 %v1456_v0 }
  0x24   :  { %1344 = vmatpush1.bf16.msra.mxu0 %v1343_v28 }
  0x25   :  { %1345 = vmatprep.subr.bf16.mxu0 %v1456_v0 }
  0x28   :  { %1347 = vmatpush1.bf16.msra.mxu0 %v1346_v31 }
  0x29   :  { %1348 = vmatprep.subr.bf16.mxu0 %v1456_v0 }
  0x2c   :  { %1350 = vmatpush1.bf16.msra.mxu0 %v1349_v34 }
  0x2d   :  { %102 = vmatprep.subr.mxu0 %v1457_v35 }
  0x30   :  { %1179 = vmatpush1.msk.msra.mxu0 %vm54_vm1, %v33_v36 }
  0x31   :  { %123 = vmatmul.mubr.f32.vlgmr.msra.gmra.mrb[0].mxu0 %v39_v37 }
 0x104   :  { %v124_v39 = vpop.f32.mrb[0].mxu0 }
 0x105   :  { %v1575_v40 = vadd.f32 %v1572_v38, %v124_v39  ;;  %v126_v41 = vpop.f32.mrb[1].mxu0 }
 0x107   :  { %v1182_v42 = vmul.f32 -1.442695, %v1575_v40  ;;  %v170_v4 = vrot.slane %v1575_v40, 2  ;;  %v290_v30 = vrot.slane %v1575_v40, 4  ;;  %v404_v58 = vrot.slane %v1575_v40, 6 }
 0x109   :  { %1384 = vpow2.f32 %v1182_v42 }
 0x113   :  { %v1385_v43 = vpop.eup %1384 }
 0x114   :  { %v136_v44 = vadd.f32 1.0, %v1385_v43 }
 0x116   :  { %1386 = vrcp.f32 %v136_v44 }
 0x120   :  { %v1387_v45 = vpop.eup %1386 }
 0x121   :  { %v139_v46 = vmul.f32 2.0, %v1387_v45 }
 0x123   :  { %v1183_v47 = vadd.f32 -1.0, %v139_v46 }
 0x125   :  { %147 = vrot.lane.b32.xlu0 %v1183_v47, %s1458_s5 }
 0x197   :  { %v148_v51 = vpop.permute.xlu0 %147 }
 0x198   :  { %v150_v52 = vmul.f32 %v1387_v45, %v148_v51 }
 0x19a   :  { %v151_v53 = vmul.f32 %v1184_v50, %v150_v52 }
 0x19c   :  { %v1185_v54 = vmul.f32 -2.0, %v151_v53 }
 0x19e   :  { %v154_v55 = vmul.f32 1.442695, %v1185_v54 }
 0x1a0   :  { %1388 = vpow2.f32 %v154_v55 }
 0x1aa   :  { %v1389_v56 = vpop.eup %1388 }
 0x1ab   :  { %v156_v57 = vadd.f32 1.0, %v1389_v56 }
 0x1ad   :  { %1390 = vrcp.f32 %v156_v57 }
 0x1b7   :  { %v1391_v61 = vpop.eup %1390 }
 0x1b8   :  { %v159_v62 = vmul.f32 2.0, %v1391_v61 }
 0x1ba   :  { %v1186_v63 = vadd.f32 -1.0, %v159_v62 }
 0x1bc   :  { %162 = vrot.lane.b32.xlu0 %v1186_v63, %s1460_s10 }
 0x1c0   :  { %254 = vrot.lane.b32.xlu0 %v151_v53, %s1461_s11 }
 0x22e   :  { %v163_v1 = vpop.permute.xlu0 %162 }
 0x22f   :  { %v165_v2 = vmul.f32 %v1387_v45, %v163_v1 }
 0x231   :  { %167 = vrot.lane.b32.xlu1 %v165_v2, %s1462_s12 }
 0x232   :  { %v255_v16 = vpop.permute.xlu0 %254 }
 0x2a3   :  { %v168_v3 = vpop.permute.xlu1 %167 }
 0x2a4   :  { %1262 = vmatmul.mubr.msk.f32.vlgmr.msra.gmra.mrb[0].mxu1 %vm172_vm4, %v168_v3 }
 0x2a5   :  { %1356 = vmatpush3.bf16.msra.mxu1 %v1586_v60  ;;  %1268 = vmatprep.mubr.msk.f32.mxu1 %vm1459_vm3, %v1457_v35 }
 0x2a6   :  { %1357 = vmatprep.subr.bf16.mxu1 %v1456_v0 }
 0x377   :  { %v241_v5 = vpop.f32.mrb[0].mxu1 }
 0x378   :  { %v242_v6 = vadd.f32 %v241_v5, %v170_v4  ;;  %v1263_v7 = vpop.f32.mrb[1].mxu1 }
 0x37a   :  { %v1188_v8 = vmul.f32 -1.442695, %v242_v6 }
 0x37c   :  { %1392 = vpow2.f32 %v1188_v8 }
 0x386   :  { %v1393_v9 = vpop.eup %1392 }
 0x387   :  { %v248_v10 = vadd.f32 1.0, %v1393_v9 }
 0x389   :  { %1394 = vrcp.f32 %v248_v10 }
 0x393   :  { %v1395_v11 = vpop.eup %1394 }
 0x394   :  { %v251_v12 = vmul.f32 2.0, %v1395_v11  ;;  %v257_v17 = vmul.f32 %v1395_v11, %v255_v16 }
 0x396   :  { %v1189_v13 = vadd.f32 -1.0, %v251_v12 }
 0x398   :  { %259 = vrot.lane.b32.xlu1 %v1189_v13, %s1458_s5 }
 0x40a   :  { %v260_v14 = vpop.permute.xlu1 %259 }
 0x40b   :  { %v262_v15 = vmul.f32 %v1395_v11, %v260_v14  ;;  %v42_v14 = vld [vmem:[%s1731_s0 + $0x18] sm:$0xff] }
 0x40c   :  { %1181 = vmatprep.mubr.msk.f32.mxu0 %vm47_vm0, %v42_v14 }
 0x40d   :  { %264 = vrot.lane.b32.xlu1 %v262_v15, %s1461_s11  ;;  %v41_v15 = vld [vmem:[%s1731_s0 + $0x10] sm:$0xff]  ;;  %s1464_s0 = smov 72  }
 0x40e   :  { %128 = vmatmul.mubr.f32.gmra.mrb[2].mxu0 %v41_v15 }
 0x47f   :  { %v265_v18 = vpop.permute.xlu1 %264 }
 0x480   :  { %v267_v19 = vadd.f32 %v265_v18, %v257_v17 }
 0x482   :  { %v1190_v20 = vmul.f32 -2.0, %v267_v19 }
 0x484   :  { %v270_v21 = vmul.f32 1.442695, %v1190_v20 }
 0x486   :  { %1396 = vpow2.f32 %v270_v21 }
 0x490   :  { %v1397_v22 = vpop.eup %1396 }
 0x491   :  { %v272_v23 = vadd.f32 1.0, %v1397_v22 }
 0x493   :  { %1398 = vrcp.f32 %v272_v23 }
 0x49d   :  { %v1399_v24 = vpop.eup %1398 }
 0x49e   :  { %v275_v25 = vmul.f32 2.0, %v1399_v24 }
 0x4a0   :  { %v1191_v26 = vadd.f32 -1.0, %v275_v25 }
 0x4a2   :  { %278 = vrot.lane.b32.xlu0 %v1191_v26, %s1463_s13 }
 0x4e1   :  { %v129_v21 = vpop.f32.mrb[2].mxu0 }
 0x4e2   :  { %v131_v22 = vpop.f32.mrb[3].mxu0  ;;  %v1646_v24 = vadd.f32 %v1572_v38, %v129_v21 }
 0x514   :  { %v279_v27 = vpop.permute.xlu0 %278 }
 0x515   :  { %v1603_v28 = vmul.f32 %v1395_v11, %v279_v27 }
 0x517   :  { %288 = vrot.lane.b32.xlu1 %v1603_v28, %s1462_s12 }
 0x589   :  { %v289_v29 = vpop.permute.xlu1 %288 }
 0x58a   :  { %1269 = vmatmul.mubr.msk.f32.vlgmr.msra.gmra.mrb[2].mxu1 %vm172_vm4, %v289_v29 }
 0x58b   :  { %1359 = vmatpush3.bf16.msra.mxu1 %v1586_v60  ;;  %1275 = vmatprep.mubr.msk.f32.mxu1 %vm1459_vm3, %v1457_v35 }
 0x58c   :  { %1360 = vmatprep.subr.bf16.mxu1 %v1456_v0 }
 0x65d   :  { %v360_v31 = vpop.f32.mrb[2].mxu1 }
 0x65e   :  { %v361_v32 = vadd.f32 %v360_v31, %v290_v30  ;;  %v1270_v33 = vpop.f32.mrb[3].mxu1 }
 0x660   :  { %v1193_v34 = vmul.f32 -1.442695, %v361_v32 }
 0x662   :  { %1400 = vpow2.f32 %v1193_v34 }
 0x66c   :  { %v1401_v36 = vpop.eup %1400 }
 0x66d   :  { %v367_v37 = vadd.f32 1.0, %v1401_v36 }
 0x66f   :  { %1402 = vrcp.f32 %v367_v37 }
 0x679   :  { %v1403_v39 = vpop.eup %1402 }
 0x67a   :  { %v370_v41 = vmul.f32 2.0, %v1403_v39  ;;  %v372_v45 = vmul.f32 %v1403_v39, %v267_v19 }
 0x67c   :  { %v1194_v42 = vadd.f32 -1.0, %v370_v41 }
 0x67e   :  { %374 = vrot.lane.b32.xlu0 %v1194_v42, %s1458_s5 }
 0x6f0   :  { %v375_v43 = vpop.permute.xlu0 %374 }
 0x6f1   :  { %v377_v44 = vmul.f32 %v1403_v39, %v375_v43 }
 0x6f3   :  { %379 = vrot.lane.b32.xlu1 %v377_v44, %s1461_s11 }
 0x765   :  { %v380_v46 = vpop.permute.xlu1 %379 }
 0x766   :  { %v382_v47 = vadd.f32 %v380_v46, %v372_v45 }
 0x768   :  { %v1195_v48 = vmul.f32 -2.0, %v382_v47 }
 0x76a   :  { %v385_v49 = vmul.f32 1.442695, %v1195_v48 }
 0x76c   :  { %1404 = vpow2.f32 %v385_v49 }
 0x776   :  { %v1405_v50 = vpop.eup %1404 }
 0x777   :  { %v387_v51 = vadd.f32 1.0, %v1405_v50 }
 0x779   :  { %1406 = vrcp.f32 %v387_v51 }
 0x783   :  { %v1407_v52 = vpop.eup %1406 }
 0x784   :  { %v390_v53 = vmul.f32 2.0, %v1407_v52 }
 0x786   :  { %v1196_v54 = vadd.f32 -1.0, %v390_v53  ;;  %v631_v53 = vrot.slane %v1646_v24, 2 }
 0x788   :  { %393 = vrot.lane.b32.xlu0 %v1196_v54, %s1463_s13 }
 0x7fa   :  { %v394_v55 = vpop.permute.xlu0 %393 }
 0x7fb   :  { %v1616_v56 = vmul.f32 %v1403_v39, %v394_v55 }
 0x7fd   :  { %402 = vrot.lane.b32.xlu1 %v1616_v56, %s1462_s12 }
 0x86f   :  { %v403_v57 = vpop.permute.xlu1 %402 }
 0x870   :  { %1276 = vmatmul.mubr.msk.f32.vlgmr.msra.gmra.mrb[4].mxu1 %vm172_vm4, %v403_v57 }
 0x871   :  { %1362 = vmatpush3.bf16.msra.mxu1 %v1586_v60  ;;  %1282 = vmatprep.mubr.msk.f32.mxu1 %vm1459_vm3, %v1457_v35 }
 0x872   :  { %1363 = vmatprep.subr.bf16.mxu1 %v1456_v0 }
 0x943   :  { %v474_v59 = vpop.f32.mrb[4].mxu1 }
 0x944   :  { %v475_v61 = vadd.f32 %v474_v59, %v404_v58  ;;  %v1277_v62 = vpop.f32.mrb[5].mxu1 }
 0x946   :  { %v1198_v63 = vmul.f32 -1.442695, %v475_v61 }
 0x948   :  { %1408 = vpow2.f32 %v1198_v63 }
 0x952   :  { %v1409_v1 = vpop.eup %1408 }
 0x953   :  { %v481_v2 = vadd.f32 1.0, %v1409_v1 }
 0x955   :  { %1410 = vrcp.f32 %v481_v2 }
 0x95f   :  { %v1411_v3 = vpop.eup %1410 }
 0x960   :  { %v484_v4 = vmul.f32 2.0, %v1411_v3  ;;  %v486_v8 = vmul.f32 %v1411_v3, %v382_v47 }
 0x962   :  { %v1199_v5 = vadd.f32 -1.0, %v484_v4 }
 0x964   :  { %488 = vrot.lane.b32.xlu0 %v1199_v5, %s1458_s5 }
 0x9d6   :  { %v489_v6 = vpop.permute.xlu0 %488 }
 0x9d7   :  { %v491_v7 = vmul.f32 %v1411_v3, %v489_v6 }
 0x9d9   :  { %493 = vrot.lane.b32.xlu1 %v491_v7, %s1461_s11 }
 0xa4b   :  { %v494_v9 = vpop.permute.xlu1 %493 }
 0xa4c   :  { %v496_v40 = vadd.f32 %v494_v9, %v486_v8 }
 0xa4e   :  { %v1200_v10 = vmul.f32 -2.0, %v496_v40 }
 0xa50   :  { %v499_v11 = vmul.f32 1.442695, %v1200_v10 }
 0xa52   :  { %1412 = vpow2.f32 %v499_v11 }
 0xa5c   :  { %v1413_v12 = vpop.eup %1412 }
 0xa5d   :  { %v501_v13 = vadd.f32 1.0, %v1413_v12 }
 0xa5f   :  { %1414 = vrcp.f32 %v501_v13 }
 0xa69   :  { %v1415_v16 = vpop.eup %1414 }
 0xa6a   :  { %v504_v17 = vmul.f32 2.0, %v1415_v16  ;;  %v745_v16 = vrot.slane %v1646_v24, 4 }
 0xa6c   :  { %v1201_v18 = vadd.f32 -1.0, %v504_v17 }
 0xa6e   :  { %507 = vrot.lane.b32.xlu0 %v1201_v18, %s1463_s13 }
 0xae0   :  { %v508_v19 = vpop.permute.xlu0 %507 }
 0xae1   :  { %v1636_v20 = vmul.f32 %v1411_v3, %v508_v19 }
 0xae3   :  { %516 = vrot.lane.b32.xlu1 %v1636_v20, %s1462_s12 }
 0xb55   :  { %v517_v23 = vpop.permute.xlu1 %516 }
 0xb56   :  { %1283 = vmatmul.mubr.msk.f32.vlgmr.msra.gmra.mrb[6].mxu1 %vm172_vm4, %v517_v23 }
 0xb57   :  { %1365 = vmatpush3.bf16.msra.mxu1 %v1586_v60  ;;  %1289 = vmatprep.mubr.msk.f32.mxu1 %vm1459_vm3, %v1457_v35 }
 0xb58   :  { %1366 = vmatprep.subr.bf16.mxu1 %v1456_v0 }
 0xc29   :  { %v586_v25 = vpop.f32.mrb[6].mxu1 }
 0xc2a   :  { %v587_v26 = vadd.f32 %v586_v25, %v1646_v24  ;;  %v1284_v27 = vpop.f32.mrb[7].mxu1 }
 0xc2c   :  { %v1203_v29 = vmul.f32 -1.442695, %v587_v26 }
 0xc2e   :  { %1416 = vpow2.f32 %v1203_v29 }
 0xc38   :  { %v1417_v30 = vpop.eup %1416 }
 0xc39   :  { %v593_v31 = vadd.f32 1.0, %v1417_v30 }
 0xc3b   :  { %1418 = vrcp.f32 %v593_v31 }
 0xc45   :  { %v1419_v32 = vpop.eup %1418 }
 0xc46   :  { %v596_v33 = vmul.f32 2.0, %v1419_v32  ;;  %v598_v39 = vmul.f32 %v1419_v32, %v496_v40 }
 0xc48   :  { %v1204_v34 = vadd.f32 -1.0, %v596_v33 }
 0xc4a   :  { %600 = vrot.lane.b32.xlu0 %v1204_v34, %s1458_s5 }
 0xcbc   :  { %v601_v36 = vpop.permute.xlu0 %600 }
 0xcbd   :  { %v603_v37 = vmul.f32 %v1419_v32, %v601_v36 }
 0xcbf   :  { %605 = vrot.lane.b32.xlu1 %v603_v37, %s1461_s11 }
 0xd31   :  { %v606_v41 = vpop.permute.xlu1 %605 }
 0xd32   :  { %v608_v42 = vadd.f32 %v606_v41, %v598_v39 }
 0xd34   :  { %v1205_v43 = vmul.f32 -2.0, %v608_v42 }
 0xd36   :  { %v611_v44 = vmul.f32 1.442695, %v1205_v43 }
 0xd38   :  { %1420 = vpow2.f32 %v611_v44 }
 0xd42   :  { %v1421_v45 = vpop.eup %1420 }
 0xd43   :  { %v613_v46 = vadd.f32 1.0, %v1421_v45 }
 0xd45   :  { %1422 = vrcp.f32 %v613_v46  ;;  %v859_v46 = vrot.slane %v1646_v24, 6 }
 0xd4f   :  { %v1423_v47 = vpop.eup %1422 }
 0xd50   :  { %v616_v48 = vmul.f32 2.0, %v1423_v47 }
 0xd52   :  { %v1206_v49 = vadd.f32 -1.0, %v616_v48 }
 0xd54   :  { %619 = vrot.lane.b32.xlu0 %v1206_v49, %s1463_s13 }
 0xdc6   :  { %v620_v50 = vpop.permute.xlu0 %619 }
 0xdc7   :  { %v1652_v51 = vmul.f32 %v1419_v32, %v620_v50 }
 0xdc9   :  { %628 = vrot.lane.b32.xlu1 %v1652_v51, %s1462_s12 }
 0xe3b   :  { %v629_v52 = vpop.permute.xlu1 %628 }
 0xe3c   :  { %1290 = vmatmul.mubr.msk.f32.vlgmr.msra.gmra.mrb[8].mxu1 %vm172_vm4, %v629_v52 }
 0xe3d   :  { %1368 = vmatpush3.bf16.msra.mxu1 %v1586_v60  ;;  %1296 = vmatprep.mubr.msk.f32.mxu1 %vm1459_vm3, %v1457_v35 }
 0xe3e   :  { %1369 = vmatprep.subr.bf16.mxu1 %v1456_v0 }
 0xf0f   :  { %v701_v54 = vpop.f32.mrb[8].mxu1 }
 0xf10   :  { %v702_v55 = vadd.f32 %v701_v54, %v631_v53  ;;  %v1291_v57 = vpop.f32.mrb[9].mxu1 }
 0xf12   :  { %v1208_v58 = vmul.f32 -1.442695, %v702_v55 }
 0xf14   :  { %1424 = vpow2.f32 %v1208_v58 }
 0xf1e   :  { %v1425_v59 = vpop.eup %1424 }
 0xf1f   :  { %v708_v61 = vadd.f32 1.0, %v1425_v59 }
 0xf21   :  { %1426 = vrcp.f32 %v708_v61 }
 0xf2b   :  { %v1427_v62 = vpop.eup %1426 }
 0xf2c   :  { %v711_v63 = vmul.f32 2.0, %v1427_v62  ;;  %v713_v4 = vmul.f32 %v1427_v62, %v608_v42 }
 0xf2e   :  { %v1209_v1 = vadd.f32 -1.0, %v711_v63 }
 0xf30   :  { %715 = vrot.lane.b32.xlu0 %v1209_v1, %s1458_s5 }
 0xfa2   :  { %v716_v2 = vpop.permute.xlu0 %715 }
 0xfa3   :  { %v718_v3 = vmul.f32 %v1427_v62, %v716_v2 }
 0xfa5   :  { %720 = vrot.lane.b32.xlu1 %v718_v3, %s1461_s11 }
0x1017   :  { %v721_v5 = vpop.permute.xlu1 %720 }
0x1018   :  { %v723_v6 = vadd.f32 %v721_v5, %v713_v4 }
0x101a   :  { %v1210_v7 = vmul.f32 -2.0, %v723_v6 }
0x101c   :  { %v726_v8 = vmul.f32 1.442695, %v1210_v7 }
0x101e   :  { %1428 = vpow2.f32 %v726_v8 }
0x1028   :  { %v1429_v9 = vpop.eup %1428 }
0x1029   :  { %v728_v40 = vadd.f32 1.0, %v1429_v9 }
0x102b   :  { %1430 = vrcp.f32 %v728_v40 }
0x1035   :  { %v1431_v10 = vpop.eup %1430 }
0x1036   :  { %v731_v11 = vmul.f32 2.0, %v1431_v10 }
0x1038   :  { %v1211_v12 = vadd.f32 -1.0, %v731_v11 }
0x103a   :  { %734 = vrot.lane.b32.xlu0 %v1211_v12, %s1463_s13 }
0x10ac   :  { %v735_v13 = vpop.permute.xlu0 %734 }
0x10ad   :  { %v1665_v14 = vmul.f32 %v1427_v62, %v735_v13 }
0x10af   :  { %743 = vrot.lane.b32.xlu1 %v1665_v14, %s1462_s12 }
0x1121   :  { %v744_v15 = vpop.permute.xlu1 %743 }
0x1122   :  { %1297 = vmatmul.mubr.msk.f32.vlgmr.msra.gmra.mrb[10].mxu1 %vm172_vm4, %v744_v15 }
0x1123   :  { %1371 = vmatpush3.bf16.msra.mxu1 %v1586_v60  ;;  %1303 = vmatprep.mubr.msk.f32.mxu1 %vm1459_vm3, %v1457_v35 }
0x1124   :  { %1372 = vmatprep.subr.bf16.mxu1 %v1456_v0 }
0x11f5   :  { %v815_v17 = vpop.f32.mrb[10].mxu1 }
0x11f6   :  { %v816_v18 = vadd.f32 %v815_v17, %v745_v16  ;;  %v1298_v19 = vpop.f32.mrb[11].mxu1 }
0x11f8   :  { %v1213_v21 = vmul.f32 -1.442695, %v816_v18 }
0x11fa   :  { %1432 = vpow2.f32 %v1213_v21 }
0x1204   :  { %v1433_v22 = vpop.eup %1432 }
0x1205   :  { %v822_v23 = vadd.f32 1.0, %v1433_v22 }
0x1207   :  { %1434 = vrcp.f32 %v822_v23 }
0x1211   :  { %v1435_v25 = vpop.eup %1434 }
0x1212   :  { %v825_v26 = vmul.f32 2.0, %v1435_v25  ;;  %v827_v0 = vmul.f32 %v1435_v25, %v723_v6 }
0x1214   :  { %v1214_v27 = vadd.f32 -1.0, %v825_v26 }
0x1216   :  { %829 = vrot.lane.b32.xlu0 %v1214_v27, %s1458_s5 }
0x1288   :  { %v830_v29 = vpop.permute.xlu0 %829 }
0x1289   :  { %v832_v30 = vmul.f32 %v1435_v25, %v830_v29 }
0x128b   :  { %834 = vrot.lane.b32.xlu1 %v832_v30, %s1461_s11 }
0x12fd   :  { %v835_v31 = vpop.permute.xlu1 %834 }
0x12fe   :  { %v837_v32 = vadd.f32 %v835_v31, %v827_v0  ;;  %v37_v31 = vld [vmem:[%s1730_s1 + $0xd0] sm:$0xff] }
0x1300   :  { %v1215_v33 = vmul.f32 -2.0, %v837_v32 }
0x1302   :  { %v840_v34 = vmul.f32 1.442695, %v1215_v33 }
0x1304   :  { %1436 = vpow2.f32 %v840_v34 }
0x130e   :  { %v1437_v36 = vpop.eup %1436 }
0x130f   :  { %v842_v37 = vadd.f32 1.0, %v1437_v36 }
0x1311   :  { %1438 = vrcp.f32 %v842_v37 }
0x131b   :  { %v1439_v39 = vpop.eup %1438 }
0x131c   :  { %v845_v41 = vmul.f32 2.0, %v1439_v39 }
0x131e   :  { %v1216_v42 = vadd.f32 -1.0, %v845_v41  ;;  %v1227_v41 = vld [vmem:[%s1730_s1 + $0xd8] ss:$0 sm:$0xff] }
0x1320   :  { %848 = vrot.lane.b32.xlu0 %v1216_v42, %s1463_s13 }
0x1392   :  { %v849_v43 = vpop.permute.xlu0 %848 }
0x1393   :  { %v1678_v44 = vmul.f32 %v1435_v25, %v849_v43 }
0x1395   :  { %857 = vrot.lane.b32.xlu1 %v1678_v44, %s1462_s12 }
0x1407   :  { %v858_v45 = vpop.permute.xlu1 %857 }
0x1408   :  { %1304 = vmatmul.mubr.msk.f32.vlgmr.msra.gmra.mrb[12].mxu1 %vm172_vm4, %v858_v45 }
0x1409   :  { %1374 = vmatpush3.bf16.msra.mxu1 %v1586_v60  ;;  %1310 = vmatprep.mubr.msk.f32.mxu1 %vm1459_vm3, %v1457_v35 }
0x140a   :  { %1313 = vmatprep.subr.mxu1 %v37_v31 }
0x14db   :  { %v929_v47 = vpop.f32.mrb[12].mxu1 }
0x14dc   :  { %v930_v48 = vadd.f32 %v929_v47, %v859_v46  ;;  %v1305_v49 = vpop.f32.mrb[13].mxu1 }
0x14de   :  { %v1218_v50 = vmul.f32 -1.442695, %v930_v48 }
0x14e0   :  { %1440 = vpow2.f32 %v1218_v50 }
0x14ea   :  { %v1441_v52 = vpop.eup %1440 }
0x14eb   :  { %v936_v53 = vadd.f32 1.0, %v1441_v52 }
0x14ed   :  { %1442 = vrcp.f32 %v936_v53 }
0x14f7   :  { %v1443_v54 = vpop.eup %1442 }
0x14f8   :  { %v939_v55 = vmul.f32 2.0, %v1443_v54  ;;  %v941_v35 = vmul.f32 %v1443_v54, %v837_v32 }
0x14fa   :  { %v1219_v57 = vadd.f32 -1.0, %v939_v55 }
0x14fc   :  { %943 = vrot.lane.b32.xlu0 %v1219_v57, %s1458_s5 }
0x156e   :  { %v944_v58 = vpop.permute.xlu0 %943 }
0x156f   :  { %v946_v60 = vmul.f32 %v1443_v54, %v944_v58 }
0x1571   :  { %948 = vrot.lane.b32.xlu1 %v946_v60, %s1461_s11 }
0x15e3   :  { %v949_v59 = vpop.permute.xlu1 %948 }
0x15e4   :  { %v951_v24 = vadd.f32 %v949_v59, %v941_v35 }
0x15e6   :  { %v1220_v61 = vmul.f32 -2.0, %v951_v24 }
0x15e8   :  { %v954_v62 = vmul.f32 1.442695, %v1220_v61 }
0x15ea   :  { %1444 = vpow2.f32 %v954_v62 }
0x15f4   :  { %v1445_v63 = vpop.eup %1444 }
0x15f5   :  { %v956_v1 = vadd.f32 1.0, %v1445_v63 }
0x15f7   :  { %1446 = vrcp.f32 %v956_v1 }
0x1601   :  { %v1447_v2 = vpop.eup %1446 }
0x1602   :  { %v959_v3 = vmul.f32 2.0, %v1447_v2 }
0x1604   :  { %v1221_v4 = vadd.f32 -1.0, %v959_v3 }
0x1606   :  { %962 = vrot.lane.b32.xlu0 %v1221_v4, %s1463_s13 }
0x1678   :  { %v963_v5 = vpop.permute.xlu0 %962 }
0x1679   :  { %v965_v6 = vmul.f32 %v1443_v54, %v963_v5 }
0x167b   :  { %971 = vrot.lane.b32.xlu1 %v965_v6, %s1462_s12 }
0x16ed   :  { %v972_v7 = vpop.permute.xlu1 %971 }
0x16ee   :  { %1311 = vmatmul.mubr.msk.f32.vlgmr.msra.gmra.mrb[14].mxu1 %vm172_vm4, %v972_v7 }
0x16ef   :  { %1314 = vmatpush3.msra.mxu1 %v37_v31 }
0x17c1   :  { %v1041_v8 = vpop.f32.mrb[14].mxu1 }
0x17c2   :  { %v1042_v9 = vadd.f32 %v1572_v38, %v1041_v8  ;;  %v1312_v40 = vpop.f32.mrb[15].mxu1 }
0x17c4   :  { %v1223_v10 = vmul.f32 -1.442695, %v1042_v9 }
0x17c6   :  { %1448 = vpow2.f32 %v1223_v10 }
0x17d0   :  { %v1449_v11 = vpop.eup %1448 }
0x17d1   :  { %v1048_v12 = vadd.f32 1.0, %v1449_v11 }
0x17d3   :  { %1450 = vrcp.f32 %v1048_v12 }
0x17dd   :  { %v1451_v13 = vpop.eup %1450 }
0x17de   :  { %v1051_v15 = vmul.f32 2.0, %v1451_v13  ;;  %v1053_v38 = vmul.f32 %v1451_v13, %v951_v24 }
0x17e0   :  { %v1224_v16 = vadd.f32 -1.0, %v1051_v15 }
0x17e2   :  { %1055 = vrot.lane.b32.xlu0 %v1224_v16, %s1458_s5 }
0x1854   :  { %v1056_v17 = vpop.permute.xlu0 %1055 }
0x1855   :  { %v1058_v18 = vmul.f32 %v1451_v13, %v1056_v17 }
0x1857   :  { %1060 = vrot.lane.b32.xlu1 %v1058_v18, %s1461_s11 }
0x185b   :  { %283 = vrot.lane.b32.xlu1 %v1603_v28, %s1464_s0 }
0x185f   :  { %512 = vrot.lane.b32.xlu1 %v1636_v20, %s1464_s0 }
0x1863   :  { %739 = vrot.lane.b32.xlu1 %v1665_v14, %s1464_s0 }
0x1867   :  { %967 = vrot.lane.b32.xlu1 %v965_v6, %s1464_s0 }
0x18c9   :  { %v1061_v19 = vpop.permute.xlu1 %1060 }
0x18ca   :  { %v1063_v21 = vadd.f32 %v1061_v19, %v1053_v38 }
0x18cc   :  { %v1225_v22 = vmul.f32 -2.0, %v1063_v21 }
0x18cd   :  { %v284_v23 = vpop.permute.xlu1 %283 }
0x18ce   :  { %v1066_v25 = vmul.f32 1.442695, %v1225_v22  ;;  %287 = vst.msk [vmem:[#allocation2] sm:$0x3] %vm286_vm5, %v284_v23 }
0x18d0   :  { %1452 = vpow2.f32 %v1066_v25 }
0x18d1   :  { %v513_v26 = vpop.permute.xlu1 %512 }
0x18d2   :  { %515 = vst.msk [vmem:[#allocation2 + $0x4] sm:$0x3] %vm286_vm5, %v513_v26 }
0x18d5   :  { %v740_v28 = vpop.permute.xlu1 %739 }
0x18d6   :  { %742 = vst.msk [vmem:[#allocation2 + $0x8] sm:$0x3] %vm286_vm5, %v740_v28 }
0x18d9   :  { %v968_v20 = vpop.permute.xlu1 %967 }
0x18da   :  { %v1453_v14 = vpop.eup %1452  ;;  %970 = vst.msk [vmem:[#allocation2 + $0xc] sm:$0x3] %vm286_vm5, %v968_v20 }
0x18db   :  { %v1068_v27 = vadd.f32 1.0, %v1453_v14 }
0x18dd   :  { %1454 = vrcp.f32 %v1068_v27 }
0x18e7   :  { %v1455_v29 = vpop.eup %1454 }
0x18e8   :  { %v1071_v30 = vmul.f32 2.0, %v1455_v29 }
0x18ea   :  { %v1226_v0 = vadd.f32 -1.0, %v1071_v30 }
0x18ec   :  { %1074 = vrot.lane.b32.xlu0 %v1226_v0, %s1463_s13 }
0x18f0   :  { %398 = vrot.lane.b32.xlu0 %v1616_v56, %s1464_s0 }
0x18f4   :  { %624 = vrot.lane.b32.xlu0 %v1652_v51, %s1464_s0 }
0x18f8   :  { %853 = vrot.lane.b32.xlu0 %v1678_v44, %s1464_s0 }
0x195e   :  { %v1075_v32 = vpop.permute.xlu0 %1074 }
0x195f   :  { %v1077_v33 = vmul.f32 %v1451_v13, %v1075_v32 }
0x1961   :  { %1079 = vrot.lane.b32.xlu0 %v1077_v33, %s1464_s0 }
0x1962   :  { %v399_v34 = vpop.permute.xlu0 %398 }
0x1963   :  { %401 = vst.msk [vmem:[#allocation2 + $0x2] sm:$0x3] %vm286_vm5, %v399_v34 }
0x1966   :  { %v625_v56 = vpop.permute.xlu0 %624 }
0x1967   :  { %627 = vst.msk [vmem:[#allocation2 + $0x6] sm:$0x3] %vm286_vm5, %v625_v56 }
0x196a   :  { %v854_v51 = vpop.permute.xlu0 %853 }
0x196b   :  { %856 = vst.msk [vmem:[#allocation2 + $0xa] sm:$0x3] %vm286_vm5, %v854_v51 }
0x196e   :  { %v1083_v36 = vld [vmem:[#allocation2] sm:$0xff] }
0x196f   :  { %1315 = vmatprep.mubr.msk.f32.mxu1 %vm1089_vm6, %v1083_v36 }
0x19d3   :  { %v1080_v37 = vpop.permute.xlu0 %1079 }
0x19d4   :  { %1082 = vst.msk [vmem:[#allocation2 + $0xe] sm:$0x3] %vm286_vm5, %v1080_v37 }
0x19db   :  { %v1084_v39 = vld [vmem:[#allocation2 + $0x8] sm:$0xff] }
0x19dc   :  { %1316 = vmatmul.mubr.msk.f32.vlgmr.msra.gmra.mrb[16].mxu1 %vm1089_vm6, %v1084_v39 }
0x1aaf   :  { %v1317_v42 = vpop.f32.mrb[16].mxu1 }
0x1ab0   :  { %v1168_v43 = vadd.f32 %v1317_v42, %v1227_v41  ;;  %v1162_v44 = vpop.f32.mrb[17].mxu1 }
0x1ab1   :  { %v1163_v45 = vadd.f32 %v1227_v41, %v1162_v44 }
0x1ab2   :  { %1173 = vst.msk [vmem:[%s1732_s2 + $0x8] sm:$0xff] %vm1171_vm7, %v1168_v43 }
0x1ab3   :  { %1172 = vst.msk [vmem:[%s1732_s2] sm:$0xff] %vm1171_vm7, %v1163_v45 }

</bundles_post_ra>
